<compile_context>
chip_gen: v5e
topology: v5e:2x2
jax: 0.10.0
libtpu: 0.0.40
codegen_flags: <defaults>
</compile_context>

<pallas_src>
import functools
import math

import numpy as np
import jax
import jax.numpy as jnp
from jax.experimental import pallas as pl
from jax.experimental.pallas import tpu as pltpu


_VMEM_LIMIT = 48 * 1024 * 1024   # fits v7x (64 MiB/TC) with headroom; also fine on v5e/v6e.
# TODO(synk): on v5e/v6e (128 MiB VMEM) this could be raised to ~96 MiB with TM=1024->2048
#             on the deep-K layer for a few extra % of HBM roofline.


def _round_up(x, m):
    return ((x + m - 1) // m) * m


# ----------------------------------------------------------------------------- Pallas kernels
def _matmul_bias_act_kernel(x_ref, w_ref, b_ref, o_ref, *, apply_leaky, slope):
    """(TM, K) bf16 @ (K, N) bf16 -> f32 acc, + bias, optional LeakyReLU, cast at the store."""
    acc = jnp.dot(x_ref[...], w_ref[...], preferred_element_type=jnp.float32)
    r = acc + b_ref[...]
    if apply_leaky:
        r = jnp.where(r >= 0, r, slope * r)
    o_ref[...] = r.astype(o_ref.dtype)


def _conv_s1_kernel(x_ref, w_ref, b_ref, o_ref, *, kh, apply_leaky, slope):
    """Stride-1 conv along H for one (batch, period-column):
       x_ref: (1, Hp, C) bf16, w_ref: (KH, C, N) bf16, o_ref: (1, Hout, N).
       Accumulates KH shifted dots instead of reading an im2col-expanded activation."""
    hout = o_ref.shape[1]
    x = x_ref[0]                                               # (Hp, C) in VMEM
    acc = jnp.dot(x[0:hout, :], w_ref[0], preferred_element_type=jnp.float32)
    for k in range(1, kh):                                     # static unroll (KH = 3 or 5)
        acc = acc + jnp.dot(x[k:k + hout, :], w_ref[k],
                            preferred_element_type=jnp.float32)
    r = acc + b_ref[...]
    if apply_leaky:
        r = jnp.where(r >= 0, r, slope * r)
    o_ref[0] = r.astype(o_ref.dtype)


# ----------------------------------------------------------------------------- kernel wrappers
def matmul_bias_act(x2d, w2d, b2d, *, apply_leaky=False, slope=0.1, out_dtype=jnp.bfloat16):
    """x2d: (M, K), w2d: (K, N) bf16 with N % 128 == 0, b2d: (1, N) f32 -> (M, N) out_dtype."""
    M, K = x2d.shape
    Kw, N = w2d.shape
    assert K == Kw and N % 128 == 0
    x2d = x2d.astype(jnp.bfloat16)                  # bf16 activations: half the DMA, bf16 MXU

    # Per-layer M tile: big tiles on the memory-bound small-K layers, 1024 on the deep layer.
    TM_target = 2048 if K <= 1024 else 1024
    TM = min(TM_target, _round_up(M, 8))
    Mp = _round_up(M, TM)
    if Mp != M:
        x2d = jnp.pad(x2d, ((0, Mp - M), (0, 0)))

    TN = N                                          # single N block (N <= 1024 in this module):
                                                    # X read once, weight resident for whole grid.
    grid = (Mp // TM,)                              # 1-D parallel grid over M -> v7x splits M
                                                    # across its two TensorCores.
    out = pl.pallas_call(
        functools.partial(_matmul_bias_act_kernel, apply_leaky=apply_leaky, slope=slope),
        out_shape=jax.ShapeDtypeStruct((Mp, N), out_dtype),
        grid=grid,
        in_specs=[
            pl.BlockSpec((TM, K), lambda m: (m, 0)),   # true K (5/160/...): no HBM K padding
            pl.BlockSpec((K, TN), lambda m: (0, 0)),   # constant index -> DMA'd once, resident
            pl.BlockSpec((1, TN), lambda m: (0, 0)),
        ],
        out_specs=pl.BlockSpec((TM, TN), lambda m: (m, 0)),
        compiler_params=pltpu.CompilerParams(
            dimension_semantics=("parallel",),
            vmem_limit_bytes=_VMEM_LIMIT),
    )(x2d, w2d, b2d)
    return out[:M] if Mp != M else out


def _im2col_h(x_bwhc, kh, stride, pad):
    """(B, W, H, C) -> (B, W, Hout, KH*C) conv patches along H (contiguous slices)."""
    B, W, H, C = x_bwhc.shape
    xp = jnp.pad(x_bwhc, ((0, 0), (0, 0), (pad, pad), (0, 0)))
    Hp = H + 2 * pad
    Hout = (Hp - kh) // stride + 1
    cols = [xp[:, :, k:k + stride * Hout:stride, :] for k in range(kh)]
    return jnp.concatenate(cols, axis=-1), Hout


def conv_h(x_bwhc, w2d, b2d, *, kh, cout, stride, pad,
           apply_leaky=False, slope=0.1, out_dtype=jnp.bfloat16):
    """Strided Conv2d with kernel (KH,1) as one fused matmul.  x: (B, W, H, Cin)."""
    B, W, H, C = x_bwhc.shape
    patches, Hout = _im2col_h(x_bwhc, kh, stride, pad)
    x2d = patches.reshape(B * W * Hout, kh * C)
    out2d = matmul_bias_act(x2d, w2d, b2d, apply_leaky=apply_leaky, slope=slope,
                            out_dtype=out_dtype)
    out = out2d.reshape(B, W, Hout, -1)
    return out[..., :cout] if out.shape[-1] != cout else out


def conv_h_s1(x_bwhc, w3d, b2d, *, kh, cout, pad,
              apply_leaky=False, slope=0.1, out_dtype=jnp.bfloat16):
    """Stride-1 Conv2d with kernel (KH,1): KH folded inside the kernel (no im2col blow-up).
    x: (B, W, H, C) -> (B, W, Hout, cout)."""
    B, W, H, C = x_bwhc.shape
    xp = jnp.pad(x_bwhc, ((0, 0), (0, 0), (pad, pad), (0, 0))).astype(jnp.bfloat16)
    Hp = H + 2 * pad
    Hout = Hp - kh + 1
    xr = xp.reshape(B * W, Hp, C)
    KH, Cw, N = w3d.shape
    assert KH == kh and Cw == C and N % 128 == 0
    out = pl.pallas_call(
        functools.partial(_conv_s1_kernel, kh=kh, apply_leaky=apply_leaky, slope=slope),
        out_shape=jax.ShapeDtypeStruct((B * W, Hout, N), out_dtype),
        grid=(B * W,),
        in_specs=[
            pl.BlockSpec((1, Hp, C), lambda r: (r, 0, 0)),
            pl.BlockSpec((kh, C, N), lambda r: (0, 0, 0)),   # weight resident across the grid
            pl.BlockSpec((1, N), lambda r: (0, 0)),
        ],
        out_specs=pl.BlockSpec((1, Hout, N), lambda r: (r, 0, 0)),
        compiler_params=pltpu.CompilerParams(
            dimension_semantics=("parallel",),
            vmem_limit_bytes=_VMEM_LIMIT),
    )(xr, w3d, b2d)
    out = out.reshape(B, W, Hout, N)
    return out[..., :cout] if N != cout else out


# ----------------------------------------------------------------------------- module config
_CONV_SPECS = [(32, 1), (128, 32), (512, 128), (1024, 512), (1024, 1024)]   # (cout, cin), KH=5
_CONV_STRIDES = [3, 3, 3, 3, 1]
_PROJ_COUTS = [32, 128, 512]                                                # Cin=1, KH=5, stride 3


# ----------------------------------------------------------------------------- parameters
def _conv_param(key, cout, cin, kh):
    kw, kb = jax.random.split(key)
    scale = 1.0 / math.sqrt(cin * kh)
    w = jax.random.normal(kw, (cout, cin, kh), jnp.float32) * scale          # torch layout
    b = jax.random.normal(kb, (cout,), jnp.float32) * scale
    return w, b


def init_params(key):
    # weight_norm is identity at init time (g = ||v||), so raw weights are the effective weights.
    # TODO(synk): if loading trained torch weights, fold g/||v|| into the kernels here.
    keys = jax.random.split(key, 12)
    dwt = [_conv_param(keys[i], 1, 2 ** (i + 1), 1) for i in range(3)]
    proj = [_conv_param(keys[3 + i], co, 1, 5) for i, co in enumerate(_PROJ_COUTS)]
    convs = [_conv_param(keys[6 + i], co, ci, 5) for i, (co, ci) in enumerate(_CONV_SPECS)]
    out = _conv_param(keys[11], 1, 1024, 3)
    return {"dwt": dwt, "proj": proj, "convs": convs, "out": out}


def _haar_bank(levels):
    """Rows = recursive Haar components in the reference's concat order; cols = input taps."""
    s = 1.0 / math.sqrt(2.0)
    f_high = np.array([s, -s], np.float64)
    f_low = np.array([s, s], np.float64)
    bank = np.ones((1, 1), np.float64)
    for _ in range(levels):
        bank = np.stack([np.kron(f, row) for row in bank for f in (f_high, f_low)])
    return bank


def _prep_matmul_layer(w, b):
    """torch (Cout, Cin, KH) -> bf16 (K, Npad) + f32 (1, Npad); K row index = kh*Cin + cin.
    K is NOT padded (no extra HBM activation reads); only Cout is padded to a lane-dense 128."""
    cout, cin, kh = w.shape
    k = kh * cin
    npad = _round_up(cout, 128)
    w2d = jnp.transpose(w, (2, 1, 0)).reshape(k, cout)
    w2d = jnp.pad(w2d, ((0, 0), (0, npad - cout))).astype(jnp.bfloat16)
    b2d = jnp.pad(b, (0, npad - cout)).reshape(1, npad).astype(jnp.float32)
    return w2d, b2d


def _prep_conv_s1_layer(w, b):
    """torch (Cout, Cin, KH) -> bf16 (KH, Cin, Npad) + f32 (1, Npad) for the stride-1 kernel."""
    cout, cin, kh = w.shape
    npad = _round_up(cout, 128)
    w3 = jnp.transpose(w, (2, 1, 0))
    w3 = jnp.pad(w3, ((0, 0), (0, 0), (0, npad - cout))).astype(jnp.bfloat16)
    b2 = jnp.pad(b, (0, npad - cout)).reshape(1, npad).astype(jnp.float32)
    return w3, b2


def prepare_params(params):
    """One-time conversion to kernel-ready arrays (all-leaf-array pytree, jit friendly)."""
    prep = {"proj": [], "convs": []}
    # TODO(synk): DiscreteWaveletTransform source was not provided; assumed orthonormal Haar
    #             analysis returning (high, low).  Each branch's (i+1) DWT levels + its 1x1
    #             Conv1d are folded into ONE equivalent 2^(i+1)-tap filter at stride 2^(i+1).
    g_list, gb_list = [], []
    for i, (w, b) in enumerate(params["dwt"]):
        bank = _haar_bank(i + 1)                                  # (2^L, 2^L) float64
        g = np.asarray(w)[0, :, 0].astype(np.float64) @ bank      # (2^L,)
        g_list.append(jnp.asarray(g, jnp.float32))
        gb_list.append(b[0])
    prep["dwt_g"] = g_list
    prep["dwt_b"] = gb_list
    for w, b in params["proj"]:
        prep["proj"].append(_prep_matmul_layer(w, b))
    for i, (w, b) in enumerate(params["convs"]):
        if _CONV_STRIDES[i] == 1:
            prep["convs"].append(_prep_conv_s1_layer(w, b))       # conv5: KH folded in-kernel
        else:
            prep["convs"].append(_prep_matmul_layer(w, b))
    prep["out"] = _prep_conv_s1_layer(*params["out"])             # output conv: stride 1, KH=3
    return prep


# ----------------------------------------------------------------------------- forward
def sub_discriminator_forward(prep, x, *, period, negative_slope):
    """x: (B, 1, T) f32 -> (flattened logits (B, Hf*period), feature_match list in NCHW f32)."""
    B, _, T = x.shape
    feature_match = []
    cached = []

    # ---- DWT side branches (folded FIR + projection conv) ----
    for i in range(3):
        step = 2 ** (i + 1)
        t_i = T // step
        win = x[:, 0, :t_i * step].reshape(B, t_i, step)
        x_out = jnp.einsum("bts,s->bt", win, prep["dwt_g"][i]) + prep["dwt_b"][i]   # (B, T_i)
        n_pad = period - t_i % period          # unconditional, exactly as in the torch reference
        # NOTE: reflect pad requires n_pad < T_i (true for realistic T / period combinations).
        x_out = jnp.pad(x_out, ((0, 0), (0, n_pad)), mode="reflect")
        h_i = (t_i + n_pad) // period
        xb = jnp.transpose(x_out.reshape(B, h_i, period), (0, 2, 1))[..., None]     # (B, p, H, 1)
        wp, bp = prep["proj"][i]
        cached.append(conv_h(xb, wp, bp, kh=5, cout=_PROJ_COUTS[i], stride=3, pad=2))

    # ---- main branch ----
    n_pad = period - T % period
    xm = jnp.pad(x[:, 0, :], ((0, 0), (0, n_pad)), mode="reflect")
    h0 = (T + n_pad) // period
    xm = jnp.transpose(xm.reshape(B, h0, period), (0, 2, 1))[..., None]             # (B, p, H0, 1)

    for i, ((cout, _), s) in enumerate(zip(_CONV_SPECS, _CONV_STRIDES)):
        wc, bc = prep["convs"][i]
        if s == 1:
            xm = conv_h_s1(xm, wc, bc, kh=5, cout=cout, pad=2,
                           apply_leaky=True, slope=negative_slope)
        else:
            xm = conv_h(xm, wc, bc, kh=5, cout=cout, stride=s, pad=2,
                        apply_leaky=True, slope=negative_slope)
        # Internal chain stays bf16; feature tensors are exported as f32 NCHW (fused cast+transpose).
        feature_match.append(jnp.transpose(xm, (0, 3, 2, 1)).astype(jnp.float32))
        if i < 3:
            xm = jnp.concatenate([xm, cached[i]], axis=2)                           # cat along H

    wo, bo = prep["out"]
    xm = conv_h_s1(xm, wo, bo, kh=3, cout=1, pad=1, out_dtype=jnp.float32)
    x_nchw = jnp.transpose(xm, (0, 3, 2, 1))                                        # (B, 1, Hf, p)
    feature_match.append(x_nchw)
    return x_nchw.reshape(B, -1), feature_match


# ----------------------------------------------------------------------------- main
if __name__ == "__main__":
    PERIOD = 2
    NEG_SLOPE = 0.1
    B, C, T = 2, 1, 64

    root = jax.random.PRNGKey(0)
    k_params, k_x = jax.random.split(root)
    params = init_params(k_params)
    prep = prepare_params(params)
    x = jax.random.normal(k_x, (B, C, T), jnp.float32)

    # --- unit check 1: fused Pallas matmul vs a jnp reference on the same bf16 operands ---
    xa = jax.random.normal(jax.random.PRNGKey(1), (37, 160), jnp.float32)
    wa = (jax.random.normal(jax.random.PRNGKey(2), (160, 128), jnp.float32) * 0.1).astype(jnp.bfloat16)
    ba = jax.random.normal(jax.random.PRNGKey(3), (1, 128), jnp.float32)
    got = matmul_bias_act(xa, wa, ba, apply_leaky=True, slope=0.1, out_dtype=jnp.float32)
    ref = jnp.dot(xa.astype(jnp.bfloat16), wa, preferred_element_type=jnp.float32) + ba
    ref = jnp.where(ref >= 0, ref, 0.1 * ref)
    assert jnp.max(jnp.abs(got - ref)) < 2e-2, "matmul kernel mismatch"

    # --- unit check 2: stride-1 KH-folded kernel == im2col + matmul path ---
    wt, bt = _conv_param(jax.random.PRNGKey(4), 128, 256, 5)
    xs = jax.random.normal(jax.random.PRNGKey(5), (1, 2, 16, 256), jnp.float32)
    w3, b3 = _prep_conv_s1_layer(wt, bt)
    w2, b2 = _prep_matmul_layer(wt, bt)
    got_s1 = conv_h_s1(xs, w3, b3, kh=5, cout=128, pad=2,
                       apply_leaky=True, slope=0.1, out_dtype=jnp.float32)
    ref_s1 = conv_h(xs, w2, b2, kh=5, cout=128, stride=1, pad=2,
                    apply_leaky=True, slope=0.1, out_dtype=jnp.float32)
    assert jnp.max(jnp.abs(got_s1 - ref_s1)) < 1e-2, "stride-1 conv kernel mismatch"

    # --- unit check 3: collapsed DWT-branch head == explicit Haar recursion + 1x1 conv ---
    def _haar(v):
        s = 1.0 / math.sqrt(2.0)
        return (v[..., 0::2] - v[..., 1::2]) * s, (v[..., 0::2] + v[..., 1::2]) * s
    cache = None
    for _lvl in range(3):
        if cache is None:
            h, l = _haar(x[:, 0, :]); cache = [h, l]
        else:
            nxt = []
            for v in cache:
                h, l = _haar(v); nxt += [h, l]
            cache = nxt
    ref_head = sum(params["dwt"][2][0][0, c, 0] * cache[c] for c in range(8)) + params["dwt"][2][1][0]
    got_head = jnp.einsum("bts,s->bt", x[:, 0, :].reshape(B, T // 8, 8), prep["dwt_g"][2]) + prep["dwt_b"][2]
    assert jnp.max(jnp.abs(got_head - ref_head)) < 1e-4, "DWT fold mismatch"

    fwd = jax.jit(functools.partial(sub_discriminator_forward,
                                    period=PERIOD, negative_slope=NEG_SLOPE))
    logits, feats = fwd(prep, x)
    jax.block_until_ready((logits, feats))

    assert logits.shape == (B, 4)                     # (B, 1*Hf*period) with T=64, period=2
    assert len(feats) == 6
    assert feats[0].shape == (B, 32, 11, PERIOD)
    assert feats[-1].shape == (B, 1, 2, PERIOD)
    print("KERNEL_OK")
</pallas_src>

<mosaic_0001>
module attributes {stable_mosaic.version = 11 : i64} {
  func.func @_matmul_bias_act_kernel(%arg0: i32, %arg1: memref<40x160xbf16, #tpu.memory_space<vmem>>, %arg2: memref<160x128xbf16, #tpu.memory_space<vmem>>, %arg3: memref<1x128xf32, #tpu.memory_space<vmem>>, %arg4: memref<40x128xf32, #tpu.memory_space<vmem>>) attributes {dimension_semantics = [#tpu.dimension_semantics<parallel>], iteration_bounds = array<i64: 1>, scalar_prefetch = 0 : i64, scratch_operands = 0 : i64, tpu.core_type = #tpu.core_type<tc>, window_params = [{transform_indices = @transform_0, window_bounds = array<i64: 40, 160>}, {pipeline_mode = #tpu.pipeline_mode<synchronous>, transform_indices = @transform_1, window_bounds = array<i64: 160, 128>}, {pipeline_mode = #tpu.pipeline_mode<synchronous>, transform_indices = @transform_2, window_bounds = array<i64: 1, 128>}, {transform_indices = @transform_3, window_bounds = array<i64: 40, 128>}]} {
    %c0 = arith.constant 0 : index
    %c0_0 = arith.constant 0 : index
    %0 = vector.load %arg1[%c0, %c0_0] : memref<40x160xbf16, #tpu.memory_space<vmem>>, vector<40x160xbf16>
    %c0_1 = arith.constant 0 : index
    %c0_2 = arith.constant 0 : index
    %1 = vector.load %arg2[%c0_1, %c0_2] : memref<160x128xbf16, #tpu.memory_space<vmem>>, vector<160x128xbf16>
    %cst = arith.constant dense<0.000000e+00> : vector<40x128xf32>
    %2 = tpu.matmul %0, %1, %cst {dimension_numbers = #tpu.dot_dimension_numbers<[1], [0], [0], [1], [0, 0, 1, 1], [], []>} : vector<40x160xbf16>, vector<160x128xbf16>, vector<40x128xf32> -> vector<40x128xf32>
    %c0_3 = arith.constant 0 : index
    %c0_4 = arith.constant 0 : index
    %3 = vector.load %arg3[%c0_3, %c0_4] : memref<1x128xf32, #tpu.memory_space<vmem>>, vector<1x128xf32>
    %4 = vector.broadcast %3 : vector<1x128xf32> to vector<40x128xf32>
    %5 = arith.addf %2, %4 : vector<40x128xf32>
    %cst_5 = arith.constant 0.000000e+00 : f32
    %6 = vector.broadcast %cst_5 : f32 to vector<40x128xf32>
    %7 = arith.cmpf oge, %5, %6 : vector<40x128xf32>
    %cst_6 = arith.constant 1.000000e-01 : f32
    %8 = vector.broadcast %cst_6 : f32 to vector<40x128xf32>
    %9 = arith.mulf %8, %5 : vector<40x128xf32>
    %10 = arith.select %7, %5, %9 : vector<40x128xi1>, vector<40x128xf32>
    %c0_7 = arith.constant 0 : index
    %c0_8 = arith.constant 0 : index
    %11 = vector.load %arg4[%c0_7, %c0_8] : memref<40x128xf32, #tpu.memory_space<vmem>>, vector<40x128xf32>
    tpu.vector_store %arg4[%c0_7, %c0_8], %10 {strides = array<i32>} : memref<40x128xf32, #tpu.memory_space<vmem>>, vector<40x128xf32>,
    return
  }
  func.func @transform_0(%arg0: i32) -> (i32, i32) {
    %c0_i32 = arith.constant 0 : i32
    %c0_i32_0 = arith.constant 0 : i32
    return %arg0, %c0_i32 : i32, i32
  }
  func.func @transform_1(%arg0: i32) -> (i32, i32) {
    %c0_i32 = arith.constant 0 : i32
    %c0_i32_0 = arith.constant 0 : i32
    %c0_i32_1 = arith.constant 0 : i32
    return %c0_i32, %c0_i32_0 : i32, i32
  }
  func.func @transform_2(%arg0: i32) -> (i32, i32) {
    %c0_i32 = arith.constant 0 : i32
    %c0_i32_0 = arith.constant 0 : i32
    %c0_i32_1 = arith.constant 0 : i32
    return %c0_i32, %c0_i32_0 : i32, i32
  }
  func.func @transform_3(%arg0: i32) -> (i32, i32) {
    %c0_i32 = arith.constant 0 : i32
    %c0_i32_0 = arith.constant 0 : i32
    return %arg0, %c0_i32 : i32, i32
  }
}

</mosaic_0001>

<bundles_post_ra>
// kernel: tpu_custom_call.1
= control target key start
LH: loop header
LB: loop body
LE: loop exit
PB: predicated region body
PF: predicated region fallthrough
CT: control target
= control target key end

     0   :  { %8 = vsyncpa [#allocation3], 0  ;;  %s480_s0 = inlined_call_operand.hbm [shape: bf16[40,160], index: 0, kind: input, shape index: {}]   ;;  %s481_s1 = inlined_call_operand.hbm [shape: bf16[160,128], index: 1, kind: input, shape index: {}]   ;;  %s482_s2 = inlined_call_operand.vmem [shape: f32[1,128], index: 2, kind: input, shape index: {}]   ;;  %s483_s3 = inlined_call_operand.hbm [shape: f32[40,128], index: 3, kind: output, shape index: {}]  }
   0x1   :  { %9 = vsyncpa [#allocation6], 0 }
   0x2   :  { %10 = vsyncpa [#allocation4], 0  ;;  %s15_s14 = sshll.u32 %s480_s0, 4  ;;  %s432_s15 = smov [#allocation2]   ;;  %s16_s14 = int_to_ptr.hbm [resolvable:$true] %s15_s14 }
   0x3   :  { %s17_s16 = sshll.u32 %s432_s15, 4  ;;  %s28_s19 = sshll.u32 %s481_s1, 4  ;;  %s18_s16 = int_to_ptr.vmem [resolvable:$true] %s17_s16  ;;  %s29_s19 = int_to_ptr.hbm [resolvable:$true] %s28_s19 }
   0x4   :  { %s433_s20 = smov 128   ;;  %s434_s21 = smov 8  }
   0x5   :  { %23 = dma.hbm_to_vmem [thread:$0]  %s16_s14, 640, %s18_s16, [#allocation3], %s433_s20, %s433_s20, %s434_s21  }
   0x6   :  { %s435_s22 = smov [#allocation5]   ;;  %s436_s24 = smov 64  }
   0x7   :  { %s30_s23 = sshll.u32 %s435_s22, 4  ;;  %s437_s0 = smov 4   ;;  %s31_s23 = int_to_ptr.vmem [resolvable:$true] %s30_s23 }
   0x8   :  { %36 = dma.hbm_to_vmem [thread:$0]  %s29_s19, 1280, %s31_s23, [#allocation6], %s436_s24, %s436_s24, %s437_s0  }
   0x9   :  { %426 = dma.done.wait [#allocation3], 640  }
   0xa   :  { %427 = vsyncadd [#allocation3], 4294966656 }
   0xb   :  { %428 = dma.done.wait [#allocation6], 1280  }
   0xc   :  { %429 = vsyncadd [#allocation6], 4294966016  ;;  %v327_v0 = vld [vmem:[#allocation5 + $0x38] sm:$0xff]  ;;  %v329_v1 = vld [vmem:[#allocation5 + $0x48] sm:$0xff]  ;;  %vm161_vm0 = vcmask 261120   ;;  %s243_s29 = sshll.u32 %s483_s3, 4  ;;  %s244_s29 = int_to_ptr.hbm [resolvable:$true] %s243_s29 }
   0xd   :  { %171 = vmatpush.bf16.msra.mxu0 %v327_v0  ;;  %330 = vmatpush.bf16.msra.mxu2 %v327_v0  ;;  %v326_v2 = vld [vmem:[#allocation5 + $0x30] sm:$0xff]  ;;  %v328_v3 = vld [vmem:[#allocation5 + $0x40] sm:$0xff]  ;;  %v316_v4 = vld [vmem:[#allocation2 + $0x4] sm:$0xf] }
   0xe   :  { %331 = vmatpush.bf16.msra.mxu3 %v327_v0  ;;  %200 = vmatpush.bf16.msra.mxu1 %v329_v1  ;;  %v261_v5 = vld [vmem:[#allocation2 + $0x8] sm:$0xf0]  ;;  %v325_v7 = vld [vmem:[#allocation5 + $0x28] sm:$0xff]  ;;  %v323_v9 = vld [vmem:[#allocation5 + $0x18] sm:$0xff] }
   0xf   :  { %v264_v6 = vor.u32 %v316_v4, %v261_v5  ;;  %v324_v8 = vld [vmem:[#allocation5 + $0x20] sm:$0xff]  ;;  %v322_v10 = vld [vmem:[#allocation5 + $0x10] sm:$0xff]  ;;  %v318_v11 = vld [vmem:[#allocation2 + $0x14] sm:$0xf] }
  0x10   :  { %v269_v12 = vld [vmem:[#allocation2 + $0x18] sm:$0xf0]  ;;  %v321_v14 = vld [vmem:[#allocation5 + $0x8] sm:$0xff]  ;;  %v52_v15 = vld [vmem:[#allocation2 + $0x20] sm:$0xff] }
  0x11   :  { %172 = vmatpush.bf16.msra.mxu0 %v326_v2  ;;  %332 = vmatpush.bf16.msra.mxu2 %v326_v2  ;;  %v272_v13 = vor.u32 %v318_v11, %v269_v12  ;;  %v320_v16 = vld [vmem:[#allocation5] sm:$0xff]  ;;  %v259_v17 = vld [vmem:[#allocation2] sm:$0xf]  ;;  %v90_v19 = vunpack.c.l.b16 %v52_v15  ;;  %v267_v20 = vld [vmem:[#allocation2 + $0x10] sm:$0xf]  ;;  %v91_v25 = vunpack.c.h.b16 %v52_v15 }
  0x12   :  { %333 = vmatpush.bf16.msra.mxu3 %v326_v2  ;;  %201 = vmatpush.bf16.msra.mxu1 %v328_v3  ;;  %v317_v18 = vld [vmem:[#allocation2 + $0x4] sm:$0xf0]  ;;  %v319_v21 = vld [vmem:[#allocation2 + $0x14] sm:$0xf0]  ;;  %v353_v30 = vld [vmem:[%s482_s2] ss:$0 sm:$0xff] }
  0x13   :  { %v260_v22 = vor.u32 %v317_v18, %v259_v17  ;;  %v268_v23 = vor.u32 %v319_v21, %v267_v20  ;;  %v96_v24 = vpack.c.b16 %v90_v19, %v90_v19  ;;  %v97_v26 = vpack.c.b16 %v91_v25, %v91_v25  ;;  %s438_s2 = smov [#allocation7]  }
  0x14   :  { %s241_s26 = sshll.u32 %s438_s2, 4  ;;  %s242_s26 = int_to_ptr.vmem [resolvable:$true] %s241_s26 }
  0x15   :  { %313 = vmatmul.msk.bf16.vlgmr.msra.gmra.mxu1 %vm161_vm0, %v264_v6  ;;  %173 = vmatpush.bf16.msra.mxu0 %v325_v7 }
  0x16   :  { %334 = vmatpush.bf16.msra.mxu2 %v325_v7  ;;  %335 = vmatpush.bf16.msra.mxu3 %v325_v7 }
  0x19   :  { %174 = vmatpush.bf16.msra.mxu0 %v324_v8 }
  0x1a   :  { %336 = vmatpush.bf16.msra.mxu2 %v324_v8  ;;  %337 = vmatpush.bf16.msra.mxu3 %v324_v8 }
  0x1d   :  { %175 = vmatpush.bf16.msra.mxu0 %v323_v9 }
  0x1e   :  { %338 = vmatpush.bf16.msra.mxu2 %v323_v9  ;;  %339 = vmatpush.bf16.msra.mxu3 %v323_v9 }
  0x21   :  { %176 = vmatpush.bf16.msra.mxu0 %v322_v10 }
  0x22   :  { %340 = vmatpush.bf16.msra.mxu2 %v322_v10  ;;  %341 = vmatpush.bf16.msra.mxu3 %v322_v10 }
  0x25   :  { %314 = vmatmul.msk.bf16.gmra.mxu1 %vm161_vm0, %v272_v13  ;;  %177 = vmatpush.bf16.msra.mxu0 %v321_v14 }
  0x26   :  { %342 = vmatpush.bf16.msra.mxu2 %v321_v14  ;;  %343 = vmatpush.bf16.msra.mxu3 %v321_v14 }
  0x29   :  { %178 = vmatpush.bf16.msra.mxu0 %v320_v16 }
  0x2a   :  { %344 = vmatpush.bf16.msra.mxu2 %v320_v16  ;;  %345 = vmatpush.bf16.msra.mxu3 %v320_v16 }
  0x2c   :  { %179 = vmatmul.bf16.vlgmr.msra.gmra.mxu0 %v260_v22 }
  0x2d   :  { %184 = vmatmul.bf16.vlgmr.msra.gmra.mxu2 %v268_v23  ;;  %189 = vmatmul.bf16.vlgmr.msra.gmra.mxu3 %v96_v24 }
  0x35   :  { %315 = vmatmul.msk.bf16.gmra.mxu1 %vm161_vm0, %v97_v26 }
  0x92   :  { %v203_v27 = vpop.f32.mrf.mxu1 }
  0x9a   :  { %v205_v28 = vpop.f32.mrf.mxu1 }
  0xa2   :  { %v208_v29 = vpop.f32.mrf.mxu1 }
  0xa9   :  { %v180_v31 = vpop.f32.mrf.mxu0 }
  0xaa   :  { %v181_v32 = vadd.f32 %v353_v30, %v180_v31  ;;  %v210_v33 = vpop.f32.mrf.mxu1 }
  0xac   :  { %v204_v34 = vadd.f32 %v203_v27, %v181_v32 }
  0xae   :  { %vm217_vm1 = vcmp.ge.f32.partialorder %v204_v34, 0.0  ;;  %v222_v35 = vmul.f32 0.1, %v204_v34 }
  0xb0   :  { %v227_v36 = vsel %vm217_vm1, %v204_v34, %v222_v35  ;;  %v185_v37 = vpop.f32.mrf.mxu2  ;;  %v190_v38 = vpop.f32.mrf.mxu3 }
  0xb1   :  { %232 = vst [vmem:[#allocation7] sm:$0xff] %v227_v36  ;;  %v186_v39 = vadd.f32 %v353_v30, %v185_v37  ;;  %v191_v40 = vadd.f32 %v353_v30, %v190_v38  ;;  %v182_v41 = vpop.f32.mrf.mxu0 }
  0xb2   :  { %v183_v42 = vadd.f32 %v353_v30, %v182_v41  ;;  %v213_v43 = vpop.f32.mrf.mxu1 }
  0xb3   :  { %v209_v44 = vadd.f32 %v208_v29, %v186_v39  ;;  %v214_v45 = vadd.f32 %v213_v43, %v191_v40 }
  0xb4   :  { %v206_v46 = vadd.f32 %v205_v28, %v183_v42 }
  0xb5   :  { %vm219_vm2 = vcmp.ge.f32.partialorder %v209_v44, 0.0  ;;  %v224_v47 = vmul.f32 0.1, %v209_v44  ;;  %vm221_vm3 = vcmp.ge.f32.partialorder %v214_v45, 0.0  ;;  %v226_v48 = vmul.f32 0.1, %v214_v45 }
  0xb6   :  { %vm218_vm4 = vcmp.ge.f32.partialorder %v206_v46, 0.0  ;;  %v223_v49 = vmul.f32 0.1, %v206_v46 }
  0xb7   :  { %v229_v50 = vsel %vm219_vm2, %v209_v44, %v224_v47  ;;  %v231_v51 = vsel %vm221_vm3, %v214_v45, %v226_v48 }
  0xb8   :  { %234 = vst [vmem:[#allocation7 + $0x10] sm:$0xff] %v229_v50  ;;  %v228_v52 = vsel %vm218_vm4, %v206_v46, %v223_v49  ;;  %v187_v53 = vpop.f32.mrf.mxu2  ;;  %v192_v54 = vpop.f32.mrf.mxu3 }
  0xb9   :  { %233 = vst [vmem:[#allocation7 + $0x8] sm:$0xff] %v228_v52  ;;  %v188_v55 = vadd.f32 %v353_v30, %v187_v53 }
  0xba   :  { %236 = vst [vmem:[#allocation7 + $0x20] sm:$0xff] %v231_v51  ;;  %v215_v56 = vpop.f32.mrf.mxu1 }
  0xbb   :  { %v211_v57 = vadd.f32 %v210_v33, %v188_v55 }
  0xbd   :  { %vm220_vm5 = vcmp.ge.f32.partialorder %v211_v57, 0.0  ;;  %v225_v58 = vmul.f32 0.1, %v211_v57 }
  0xbf   :  { %v230_v59 = vsel %vm220_vm5, %v211_v57, %v225_v58 }
  0xc0   :  { %235 = vst [vmem:[#allocation7 + $0x18] sm:$0xff] %v230_v59 }
  0xc1   :  { %249 = dma.vmem_to_hbm [thread:$0]  %s242_s26, 640, %s244_s29, [#allocation4], %s433_s20, %s433_s20, %s434_s21  }
  0xc2   :  { %430 = dma.done.wait [#allocation4], 640  }
  0xc3   :  { %431 = vsyncadd [#allocation4], 4294966656 }
  0xc4   :  { %254 = vsyncpa [#allocation3], 1 }
  0xc5   :  { %255 = vsyncpa [#allocation6], 1 }
  0xc6   :  { %256 = vsyncpa [#allocation4], 1 }

</bundles_post_ra>
